<compile_context>
chip_gen: v5e
topology: v5e:2x2
jax: 0.10.0
libtpu: 0.0.40
codegen_flags: <defaults>
</compile_context>

<pallas_src>
import functools

import jax
import jax.numpy as jnp
from jax.experimental import pallas as pl
from jax.experimental.pallas import tpu as pltpu


def _round_up(x, m):
    return ((x + m - 1) // m) * m


def _patch_embed_ln_kernel(x_ref, w_ref, p_ref, o_ref, *, inv_n, eps):
    """One row tile: emb = x @ w + bias ; out = LayerNorm(emb) * gamma + beta.

    x_ref: (TM, K)  flattened patches, bf16        (VMEM, pipelined)
    w_ref: (K, Np)  patch-embedding weight, bf16   (VMEM, resident, 1 buffer)
    p_ref: (8, Np)  packed f32 params: row0=bias, row1=gamma, row2=beta
    o_ref: (TM, Np) output rows, bf16              (VMEM, pipelined)
    """
    # bf16 operands straight into the MXU, f32 accumulation.
    emb = jnp.dot(x_ref[...], w_ref[...], preferred_element_type=jnp.float32)
    emb = emb + p_ref[0:1, :]                      # bias

    # Single-pass statistics (sum + sum-of-squares). Padded hidden lanes are
    # exactly zero (zero W columns / bias), so the sums are unaffected;
    # inv_n = 1/true_hidden uses the real hidden width.
    s = jnp.sum(emb, axis=-1, keepdims=True)
    ss = jnp.sum(emb * emb, axis=-1, keepdims=True)
    mean = s * inv_n
    var = jnp.maximum(ss * inv_n - mean * mean, 0.0)
    inv = jax.lax.rsqrt(var + eps)                 # EUP rsqrt

    # Padded lanes: gamma = beta = 0 -> output padding stays exactly 0.
    out = (emb - mean) * inv * p_ref[1:2, :] + p_ref[2:3, :]
    o_ref[...] = out.astype(o_ref.dtype)


def image_encoder_forward(pixel_values, params, patch_size, *, tm=512,
                          out_dtype=jnp.bfloat16, eps=1e-5):
    """pixel_values: (B, C, H, W) NCHW -> (B, num_patches, hidden) in out_dtype."""
    B, C, H, W = pixel_values.shape
    p = patch_size
    assert H % p == 0 and W % p == 0
    hp, wp = H // p, W // p
    num_patches = hp * wp
    K = C * p * p

    w_conv = params["patch_weight"]            # (hidden, C, p, p) — conv layout
    hidden = w_conv.shape[0]

    M = B * num_patches
    Np = _round_up(hidden, 128)                # lane-dense, unmasked stores

    # Row tile: keep it <= tm but ensure >= ~8 grid steps so both v7x
    # TensorCores get work and the pipeline has depth.  (On v6e, sweeping
    # tm up to 1024 is worthwhile for very large M.)
    tm = max(8, min(tm, _round_up(pl.cdiv(M, 8), 8)))
    Mp = _round_up(M, tm)

    # ---- glue: non-overlapping patch extraction (== conv k=p, s=p) ----
    # Cast to bf16 BEFORE the transpose so the layout pass moves half the bytes.
    x = pixel_values.astype(jnp.bfloat16)
    x = x.reshape(B, C, hp, p, wp, p).transpose(0, 2, 4, 1, 3, 5).reshape(M, K)
    if Mp > M:
        x = jnp.pad(x, ((0, Mp - M), (0, 0)))  # zero rows -> finite LN, sliced off

    # Weight: (hidden, K) -> (K, hidden) -> pad hidden to Np (zero columns).
    w = w_conv.reshape(hidden, K).T.astype(jnp.bfloat16)
    if Np > hidden:
        w = jnp.pad(w, ((0, 0), (0, Np - hidden)))

    # Pack bias / gamma / beta into one resident (8, Np) f32 block.
    pars = jnp.zeros((8, Np), jnp.float32)
    pars = pars.at[0, :hidden].set(params["patch_bias"].astype(jnp.float32))
    pars = pars.at[1, :hidden].set(params["ln_gamma"].astype(jnp.float32))
    pars = pars.at[2, :hidden].set(params["ln_beta"].astype(jnp.float32))

    grid = (Mp // tm,)

    # Per-step VMEM: double-buffered bf16 x / out tiles, single-buffered W and
    # params, plus headroom for the f32 emb tile and LN temporaries.
    step_bytes = (2 * tm * K * 2          # x double buffer (bf16)
                  + 2 * tm * Np * 2       # out double buffer (bf16)
                  + K * Np * 2            # W, single buffer (bf16)
                  + 8 * Np * 4            # packed LN params
                  + 2 * tm * Np * 4)      # f32 emb + temporaries headroom
    vmem_limit = int(min(max(step_bytes + (8 << 20), 32 << 20), 48 << 20))

    cost = pl.CostEstimate(
        flops=2 * Mp * K * Np,
        transcendentals=Mp,
        bytes_accessed=Mp * K * 2 + K * Np * 2 + 8 * Np * 4 + Mp * Np * 2,
    )

    kernel = functools.partial(
        _patch_embed_ln_kernel, inv_n=1.0 / hidden, eps=eps)

    out = pl.pallas_call(
        kernel,
        out_shape=jax.ShapeDtypeStruct((Mp, Np), out_dtype),
        grid_spec=pltpu.PrefetchScalarGridSpec(
            num_scalar_prefetch=0,
            grid=grid,
            in_specs=[
                # X row tile: K kept unpadded (block dim == full array dim).
                pl.BlockSpec((tm, K), lambda i: (i, 0)),
                # Resident weight: constant index map, single buffer.
                pl.BlockSpec((K, Np), lambda i: (0, 0),
                             pipeline_mode=pl.Buffered(1)),
                # Resident packed bias/gamma/beta, single buffer.
                pl.BlockSpec((8, Np), lambda i: (0, 0),
                             pipeline_mode=pl.Buffered(1)),
            ],
            out_specs=pl.BlockSpec((tm, Np), lambda i: (i, 0)),
        ),
        compiler_params=pltpu.CompilerParams(
            dimension_semantics=("parallel",),   # megacore-shard row tiles
            vmem_limit_bytes=vmem_limit,
        ),
        cost_estimate=cost,
    )(x, w, pars)

    # Usually a no-op on the row axis (Mp == M); only trims hidden padding.
    out = out[:M, :hidden]
    return out.reshape(B, num_patches, hidden)


def _reference_forward(pixel_values, params, patch_size, eps=1e-5):
    """Pure-JAX reference (conv k=p,s=p + LayerNorm), matching the kernel's
    bf16 operand precision with f32 accumulation."""
    B, C, H, W = pixel_values.shape
    p = patch_size
    hp, wp = H // p, W // p
    x = pixel_values.reshape(B, C, hp, p, wp, p)
    x = x.transpose(0, 2, 4, 1, 3, 5).reshape(B * hp * wp, C * p * p)
    w = params["patch_weight"].reshape(params["patch_weight"].shape[0], -1).T
    x32 = x.astype(jnp.bfloat16).astype(jnp.float32)
    w32 = w.astype(jnp.bfloat16).astype(jnp.float32)
    emb = x32 @ w32 + params["patch_bias"][None, :]
    mean = emb.mean(-1, keepdims=True)
    var = ((emb - mean) ** 2).mean(-1, keepdims=True)
    out = (emb - mean) * jax.lax.rsqrt(var + eps)
    out = out * params["ln_gamma"][None, :] + params["ln_beta"][None, :]
    return out.reshape(B, hp * wp, -1)


if __name__ == "__main__":
    # Small shapes consistent with an image-encoder config:
    # batch=2, in_channels=4, image 16x16, patch=4, hidden=32.
    B, C, H, W = 2, 4, 16, 16
    patch_size = 4
    hidden = 32
    num_patches = (H // patch_size) * (W // patch_size)

    key = jax.random.PRNGKey(0)
    k_x, k_w, k_b, k_g, k_beta = jax.random.split(key, 5)

    pixel_values = jax.random.normal(k_x, (B, C, H, W), dtype=jnp.float32)

    params = {
        # conv weight in PyTorch layout (out_ch, in_ch, kH, kW)
        "patch_weight": 0.05 * jax.random.normal(
            k_w, (hidden, C, patch_size, patch_size), dtype=jnp.float32),
        "patch_bias": 0.01 * jax.random.normal(k_b, (hidden,), dtype=jnp.float32),
        "ln_gamma": jnp.ones((hidden,), dtype=jnp.float32)
        + 0.01 * jax.random.normal(k_g, (hidden,), dtype=jnp.float32),
        "ln_beta": 0.01 * jax.random.normal(k_beta, (hidden,), dtype=jnp.float32),
    }

    out = image_encoder_forward(pixel_values, params, patch_size)
    out = jax.block_until_ready(out)

    ref = _reference_forward(pixel_values, params, patch_size)
    assert out.shape == (B, num_patches, hidden)
    assert out.dtype == jnp.bfloat16
    # Kernel emits bf16 (per perf review); compare with bf16-level tolerance.
    assert jnp.allclose(out.astype(jnp.float32), ref, atol=2e-2, rtol=2e-2)

    # TODO(synk): the PyTorch base class is abstract (forward is @abstractmethod);
    # attention-backend plumbing has no compute and is not translated.
    print("KERNEL_OK")
</pallas_src>

<mosaic_0001>
module attributes {stable_mosaic.version = 11 : i64} {
  func.func @_patch_embed_ln_kernel(%arg0: i32, %arg1: memref<8x64xbf16, #tpu.memory_space<vmem>>, %arg2: memref<64x128xbf16, #tpu.memory_space<vmem>>, %arg3: memref<8x128xf32, #tpu.memory_space<vmem>>, %arg4: memref<8x128xbf16, #tpu.memory_space<vmem>>) attributes {dimension_semantics = [#tpu.dimension_semantics<parallel>], iteration_bounds = array<i64: 4>, scalar_prefetch = 0 : i64, scratch_operands = 0 : i64, tpu.core_type = #tpu.core_type<tc>, window_params = [{transform_indices = @transform_0, window_bounds = array<i64: 8, 64>}, {pipeline_mode = #tpu.pipeline_mode<synchronous>, transform_indices = @transform_1, window_bounds = array<i64: 64, 128>}, {pipeline_mode = #tpu.pipeline_mode<synchronous>, transform_indices = @transform_2, window_bounds = array<i64: 8, 128>}, {transform_indices = @transform_3, window_bounds = array<i64: 8, 128>}]} {
    %c0 = arith.constant 0 : index
    %c0_0 = arith.constant 0 : index
    %0 = vector.load %arg1[%c0, %c0_0] : memref<8x64xbf16, #tpu.memory_space<vmem>>, vector<8x64xbf16>
    %c0_1 = arith.constant 0 : index
    %c0_2 = arith.constant 0 : index
    %1 = vector.load %arg2[%c0_1, %c0_2] : memref<64x128xbf16, #tpu.memory_space<vmem>>, vector<64x128xbf16>
    %cst = arith.constant dense<0.000000e+00> : vector<8x128xf32>
    %2 = tpu.matmul %0, %1, %cst {dimension_numbers = #tpu.dot_dimension_numbers<[1], [0], [0], [1], [0, 0, 1, 1], [], []>} : vector<8x64xbf16>, vector<64x128xbf16>, vector<8x128xf32> -> vector<8x128xf32>
    %c0_3 = arith.constant 0 : index
    %c0_4 = arith.constant 0 : index
    %3 = vector.load %arg3[%c0_3, %c0_4] : memref<8x128xf32, #tpu.memory_space<vmem>>, vector<1x128xf32>
    %4 = vector.broadcast %3 : vector<1x128xf32> to vector<8x128xf32>
    %5 = arith.addf %2, %4 : vector<8x128xf32>
    %cst_5 = arith.constant dense<0.000000e+00> : vector<8xf32>
    %6 = vector.multi_reduction <add>, %5, %cst_5 [1] : vector<8x128xf32> to vector<8xf32>
    %7 = vector.shape_cast %6 : vector<8xf32> to vector<8x1xf32>
    %8 = arith.mulf %5, %5 : vector<8x128xf32>
    %cst_6 = arith.constant dense<0.000000e+00> : vector<8xf32>
    %9 = vector.multi_reduction <add>, %8, %cst_6 [1] : vector<8x128xf32> to vector<8xf32>
    %10 = vector.shape_cast %9 : vector<8xf32> to vector<8x1xf32>
    %cst_7 = arith.constant 3.125000e-02 : f32
    %11 = vector.broadcast %cst_7 : f32 to vector<8x1xf32>
    %12 = arith.mulf %7, %11 : vector<8x1xf32>
    %cst_8 = arith.constant 3.125000e-02 : f32
    %13 = vector.broadcast %cst_8 : f32 to vector<8x1xf32>
    %14 = arith.mulf %10, %13 : vector<8x1xf32>
    %15 = arith.mulf %12, %12 : vector<8x1xf32>
    %16 = arith.subf %14, %15 : vector<8x1xf32>
    %cst_9 = arith.constant 0.000000e+00 : f32
    %17 = vector.broadcast %cst_9 : f32 to vector<8x1xf32>
    %18 = arith.maximumf %16, %17 : vector<8x1xf32>
    %cst_10 = arith.constant 9.99999974E-6 : f32
    %19 = vector.broadcast %cst_10 : f32 to vector<8x1xf32>
    %20 = arith.addf %18, %19 : vector<8x1xf32>
    %21 = math.rsqrt %20 : vector<8x1xf32>
    %22 = vector.broadcast %12 : vector<8x1xf32> to vector<8x128xf32>
    %23 = arith.subf %5, %22 : vector<8x128xf32>
    %24 = vector.broadcast %21 : vector<8x1xf32> to vector<8x128xf32>
    %25 = arith.mulf %23, %24 : vector<8x128xf32>
    %c1 = arith.constant 1 : index
    %c0_11 = arith.constant 0 : index
    %26 = vector.load %arg3[%c1, %c0_11] : memref<8x128xf32, #tpu.memory_space<vmem>>, vector<1x128xf32>
    %27 = vector.broadcast %26 : vector<1x128xf32> to vector<8x128xf32>
    %28 = arith.mulf %25, %27 : vector<8x128xf32>
    %c2 = arith.constant 2 : index
    %c0_12 = arith.constant 0 : index
    %29 = vector.load %arg3[%c2, %c0_12] : memref<8x128xf32, #tpu.memory_space<vmem>>, vector<1x128xf32>
    %30 = vector.broadcast %29 : vector<1x128xf32> to vector<8x128xf32>
    %31 = arith.addf %28, %30 : vector<8x128xf32>
    %32 = arith.truncf %31 : vector<8x128xf32> to vector<8x128xbf16>
    %c0_13 = arith.constant 0 : index
    %c0_14 = arith.constant 0 : index
    %33 = vector.load %arg4[%c0_13, %c0_14] : memref<8x128xbf16, #tpu.memory_space<vmem>>, vector<8x128xbf16>
    tpu.vector_store %arg4[%c0_13, %c0_14], %32 {strides = array<i32>} : memref<8x128xbf16, #tpu.memory_space<vmem>>, vector<8x128xbf16>,
    return
  }
  func.func @transform_0(%arg0: i32) -> (i32, i32) {
    %c0_i32 = arith.constant 0 : i32
    %c0_i32_0 = arith.constant 0 : i32
    return %arg0, %c0_i32 : i32, i32
  }
  func.func @transform_1(%arg0: i32) -> (i32, i32) {
    %c0_i32 = arith.constant 0 : i32
    %c0_i32_0 = arith.constant 0 : i32
    %c0_i32_1 = arith.constant 0 : i32
    return %c0_i32, %c0_i32_0 : i32, i32
  }
  func.func @transform_2(%arg0: i32) -> (i32, i32) {
    %c0_i32 = arith.constant 0 : i32
    %c0_i32_0 = arith.constant 0 : i32
    %c0_i32_1 = arith.constant 0 : i32
    return %c0_i32, %c0_i32_0 : i32, i32
  }
  func.func @transform_3(%arg0: i32) -> (i32, i32) {
    %c0_i32 = arith.constant 0 : i32
    %c0_i32_0 = arith.constant 0 : i32
    return %arg0, %c0_i32 : i32, i32
  }
}

</mosaic_0001>

<bundles_post_ra>
// kernel: tpu_custom_call.1
= control target key start
LH: loop header
LB: loop body
LE: loop exit
PB: predicated region body
PF: predicated region fallthrough
CT: control target
= control target key end

     0   :  { %8 = vsyncpa [#allocation3], 0  ;;  %s852_s0 = inlined_call_operand.hbm [shape: bf16[32,64], index: 0, kind: input, shape index: {}]   ;;  %s853_s1 = inlined_call_operand.hbm [shape: bf16[64,128], index: 1, kind: input, shape index: {}]   ;;  %s854_s2 = inlined_call_operand.hbm [shape: f32[8,128], index: 2, kind: input, shape index: {}]   ;;  %s855_s3 = inlined_call_operand.hbm [shape: bf16[32,128], index: 3, kind: output, shape index: {}]  }
   0x1   :  { %10 = vsyncpa [#allocation3 + $0x1], 0 }
   0x2   :  { %11 = vsyncpa [#allocation6], 0 }
   0x3   :  { %12 = vsyncpa [#allocation4], 0 }
   0x4   :  { %14 = vsyncpa [#allocation4 + $0x1], 0  ;;  %s705_s12 = smov 0   ;;  %s707_s13 = smov 0  }
   0x5   :  { %s709_s14 = smov 0   ;;  %s711_s15 = smov 0  }
   0x6 LB: > { %s130_s18 = sshll.u32 %s853_s1, 4  ;;  %s729_s19 = sadd.s32 4294967295, %s679_s15   ;;  %s679_s15 = sphi %s711_s15, %s865_s15   ;;  %s675_s14 = sphi %s709_s14, %s864_s14   ;;  %s671_s13 = sphi %s707_s13, %s863_s13   ;;  %s667_s12 = sphi %s705_s12, %s862_s12   ;;  %s131_s18 = int_to_ptr.hbm [resolvable:$true] %s130_s18 }
   0x7   : > { %p409_p0 = scmp.ge.s32.totalorder %s679_s15, 1  ;;  %p41_p1 = scmp.eq.s32.totalorder %s729_s19, 0 }
   0x8   : > { %p119_p2 = scmp.lt.s32.totalorder %s679_s15, 5  ;;  %s681_s21 = smov [#allocation5]  }
   0x9   : > { %s132_s22 = sshll.u32 %s681_s21, 4  ;;  %s145_s25 = sshll.u32 %s854_s2, 4  ;;  %s133_s22 = int_to_ptr.vmem [resolvable:$true] %s132_s22  ;;  %s146_s25 = int_to_ptr.hbm [resolvable:$true] %s145_s25 }
   0xa   : > { %p734_p3 = pnand %p409_p0, %p119_p2  ;;  %s682_s26 = smov [#allocation7]  }
   0xb   : > { %s147_s27 = sshll.u32 %s682_s26, 4  ;;  %s683_s28 = smov 64   ;;  %s148_s27 = int_to_ptr.vmem [resolvable:$true] %s147_s27 }
   0xc   : > { %p457_p4 = pneg %p734_p3  ;;  %s684_s29 = smov 4  }
   0xd   : > { %s408_s30 = sadd.s32 4294967294, %s679_s15   ;;  %s747_s4 = sadd.s32 1, %s679_s15  }
   0xe   : > { %p458_p5 = pnand %p457_p4, %p41_p1  ;;  %s24_s5 = ssub.s32 %s679_s15, %s747_s4 }
   0xf   : > { %s27_s6 = sadd.s32 1, %s675_s14  ;;  %p25_p6 = scmp.eq.s32.totalorder %s24_s5, 0 }
  0x10   : > { %460 = dma.hbm_to_vmem [thread:$0]  (!%p458_p5), %s131_s18, 512, %s133_s22, [#allocation6], %s683_s28, %s683_s28, %s684_s29  }
  0x11   : > { %463 = dma.hbm_to_vmem [thread:$0]  (!%p458_p5), %s146_s25, 128, %s148_s27, [#allocation6]  }
  0x12   : > { %p34_p7 = scmp.ne.s32.totalorder %s675_s14, %s671_s13  ;;  %p35_p8 = scmp.eq.s32.totalorder %s679_s15, 0 }
  0x13   : > { %p40_p9 = scmp.ne.s32.totalorder %s671_s13, %s667_s12  ;;  %p106_p12 = scmp.eq.s32.totalorder %s729_s19, 3 }
  0x14   : > { %s758_s7 = scalar_select %p25_p6, %s675_s14, %s27_s6  }
  0x15   : > { %p760_p10 = por %p35_p8, %p34_p7  ;;  %p766_p11 = por %p41_p1, %p40_p9 }
  0x16   : > { %p112_p13 = scmp.eq.s32.totalorder %s408_s30, 3  ;;  %p474_p0 = scmp.lt.s32.totalorder %s679_s15, 4 }
  0x17   : > { %s158_s10 = sand.u32 1, %s675_s14   ;;  %p773_p2 = por %p106_p12, %p34_p7 }
  0x18   : > { %p777_p4 = por %p112_p13, %p40_p9  ;;  %s413_s17 = sshll.u32 %s158_s10, 2 }
  0x19   : > { %s414_s18 = sshll.u32 %s679_s15, 2  ;;  %s162_s24 = scalar_lea.vmem [#allocation2], %s413_s17 }
  0x1a   : > { %s166_s23 = scalar_lea.hbm %s852_s0, %s414_s18  ;;  %s170_s25 = sshll.u32 %s162_s24, 4  ;;  %s171_s25 = int_to_ptr.vmem [resolvable:$true] %s170_s25 }
  0x1b   : > { %s168_s26 = sshll.u32 %s166_s23, 4  ;;  %p787_p5 = pnand %p474_p0, %p760_p10  ;;  %s169_s26 = int_to_ptr.hbm [resolvable:$true] %s168_s26 }
  0x1c   : > { %s159_s28 = scalar_lea.sflag [#allocation3], %s158_s10  ;;  %s579_s29 = sshra.s32 %s169_s26, 4  ;;  %s580_s29 = int_to_ptr.hbm [resolvable:$true] %s579_s29 }
  0x1d   : > { %s581_s30 = scalar_lea.hbm %s580_s29, 4  ;;  %p583_p7 = pneg %p787_p5 }
  0x1e   : > { %p582_p6 = scmp.ne.s32.totalorder %s580_s29, %s581_s30  ;;  %s586_s17 = scalar_lea.hbm %s852_s0, 16 }
  0x1f   : > { %p587_p10 = scmp.lt.s32.totalorder %s580_s29, %s852_s0  ;;  %p588_p12 = scmp.lt.s32.totalorder %s586_s17, %s581_s30 }
  0x20   : > { %p584_p8 = pnand %p583_p7, %p582_p6 }
  0x21   : > { %p589_p13 = por %p588_p12, %p587_p10 }
  0x22   : > { %p585_p9 = pneg %p584_p8 }
  0x24   : > { %p590_p0 = pnand %p589_p13, %p585_p9 }
  0x26   : > { %593 = shalt.err (!%p590_p0)
}
  0x27   : > { %467 = dma.hbm_to_vmem [thread:$0]  (!%p787_p5), %s169_s26, 64, %s171_s25, %s159_s28  }
  0x28   : > { %179 = sbr.rel (%p734_p3) target bundleno = 353 (0x161), region = 32  ;;  %s804_s10 = sand.u32 (!%p734_p3), 1, %s671_s13  }
  0x29   : > { %s416_s21 = sshll.u32 (!%p734_p3), %s804_s10, 2  ;;  %s182_s22 = scalar_lea.sflag (!%p734_p3), [#allocation3], %s804_s10 }
  0x2a   : > { %s185_s23 = scalar_lea.vmem (!%p734_p3), [#allocation2], %s416_s21 }
  0x2d   : > { %654 = dma.done.wait (%p766_p11), %s182_s22, 64  }
  0x2e   : > { %656 = vsyncadd (%p766_p11), %s182_s22, 4294967232 }
  0x2f   : > { %658 = dma.done.wait (%p41_p1), [#allocation6], 640  }
  0x30   : > { %660 = vsyncadd (%p41_p1), [#allocation6], 4294966656  ;;  %v444_v0 = vld [vmem:[#allocation5 + $0x18] sm:$0xff]  ;;  %v443_v1 = vld [vmem:[#allocation5 + $0x10] sm:$0xff]  ;;  %vm255_vm0 = vcmask 523264   ;;  %s438_s20 = sshll.u32 %s729_s19, 2 }
  0x31   : > { %263 = vmatpush.bf16.msra.mxu0 %v444_v0  ;;  %v442_v2 = vld [vmem:[#allocation5 + $0x8] sm:$0xff]  ;;  %v441_v3 = vld [vmem:[#allocation5] sm:$0xff]  ;;  %v220_v4 = vld [vmem:[%s185_s23] sm:$0xf]  ;;  %s314_s25 = scalar_lea.hbm %s855_s3, %s438_s20  ;;  %s218_s26 = scalar_lea.vmem [#allocation8], %s416_s21 }
  0x32   : > { %v514_v5 = vld [vmem:[#allocation7] ss:$0 sm:$0xff]  ;;  %v515_v25 = vld [vmem:[#allocation7 + $0x1] ss:$0 sm:$0xff]  ;;  %v516_v28 = vld [vmem:[#allocation7 + $0x2] ss:$0 sm:$0xff] }
  0x33   : > { %s316_s27 = sshll.u32 %s218_s26, 4  ;;  %s318_s28 = sshll.u32 %s314_s25, 4  ;;  %s317_s27 = int_to_ptr.vmem [resolvable:$true] %s316_s27  ;;  %s319_s28 = int_to_ptr.hbm [resolvable:$true] %s318_s28 }
  0x34   : > { %s304_s19 = scalar_lea.sflag [#allocation4], %s804_s10  ;;  %s623_s29 = sshra.s32 %s319_s28, 4  ;;  %s624_s29 = int_to_ptr.hbm [resolvable:$true] %s623_s29 }
  0x35   : > { %264 = vmatpush.bf16.msra.mxu0 %v443_v1  ;;  %s625_s30 = scalar_lea.hbm %s624_s29, 4  ;;  %s629_s17 = scalar_lea.hbm %s855_s3, 16 }
  0x36   : > { %p626_p1 = scmp.ne.s32.totalorder %s624_s29, %s625_s30  ;;  %p630_p5 = scmp.lt.s32.totalorder %s624_s29, %s855_s3 }
  0x37   : > { %p631_p6 = scmp.lt.s32.totalorder %s629_s17, %s625_s30 }
  0x38   : > { %p627_p3 = pnand %p626_p1, %p773_p2 }
  0x39   : > { %265 = vmatpush.bf16.msra.mxu0 %v442_v2  ;;  %p632_p7 = por %p631_p6, %p630_p5 }
  0x3a   : > { %p628_p11 = pneg %p627_p3 }
  0x3c   : > { %p633_p8 = pnand %p632_p7, %p628_p11 }
  0x3d   : > { %266 = vmatpush.bf16.msra.mxu0 %v441_v3 }
  0x40   : > { %436 = vmatmul.msk.bf16.vlgmr.msra.gmra.mxu0 %vm255_vm0, %v220_v4 }
  0xbd   : > { %v268_v6 = vpop.f32.mrf.mxu0 }
  0xbe   : > { %v269_v7 = vadd.f32 %v514_v5, %v268_v6 }
  0xc0   : > { %272 = vadd.xlane.f32.xlu0 %v269_v7  ;;  %v274_v9 = vmul.f32 %v269_v7, %v269_v7 }
  0xc5   : > { %v270_v8 = vpop.f32.mrf.mxu0 }
  0xc8   : > { %275 = vadd.xlane.f32.xlu0 %v274_v9 }
 0x133   : > { %v273_v10 = vpop.xlane.xlu0 %272 }
 0x134   : > { %v277_v11 = vmul.f32 0.03125, %v273_v10 }
 0x136   : > { %v279_v13 = vmul.f32 %v277_v11, %v277_v11  ;;  %v293_v24 = vsub.f32 %v269_v7, %v277_v11 }
 0x13b   : > { %v276_v12 = vpop.xlane.xlu0 %275 }
 0x13c   : > { %v278_v14 = vmul.f32 0.03125, %v276_v12 }
 0x13e   : > { %v280_v15 = vsub.f32 %v278_v14, %v279_v13 }
 0x140   : > { %v281_v16 = vmax.f32 %v280_v15, 0.0 }
 0x142   : > { %v282_v17 = vadd.f32 1e-05, %v281_v16 }
 0x144   : > { %517 = vrsqrt.f32 %v282_v17  ;;  %vm289_vm2 = vweird.f32 %v282_v17 }
 0x14a   : > { %v518_v18 = vpop.eup %517 }
 0x14b   : > { %v284_v19 = vmul.f32 %v518_v18, %v282_v17  ;;  %vm290_vm1 = vweird.f32 %v518_v18 }
 0x14c   : > { %vm291_vm3 = vmor %vm289_vm2, %vm290_vm1 }
 0x14d   : > { %v285_v20 = vmul.f32 %v518_v18, %v284_v19 }
 0x14f   : > { %v286_v21 = vmul.f32 0.5, %v285_v20 }
 0x151   : > { %v287_v22 = vsub.f32 1.5, %v286_v21 }
 0x153   : > { %v288_v23 = vmul.f32 %v518_v18, %v287_v22 }
 0x155   : > { %v292_v26 = vsel %vm291_vm3, %v518_v18, %v288_v23 }
 0x156   : > { %v294_v27 = vmul.f32 %v293_v24, %v292_v26 }
 0x158   : > { %v297_v29 = vmul.f32 %v515_v25, %v294_v27 }
 0x15a   : > { %v300_v30 = vadd.f32 %v516_v28, %v297_v29 }
 0x15c   : > { %v301_v31 = vpack.c.bf16 %v300_v30, %v300_v30 }
 0x15e   : > { %302 = vst [vmem:[%s218_s26] sm:$0xf] %v301_v31 }
 0x15f   : > { %636 = shalt.err (!%p633_p8)
}
 0x160   : > { %455 = dma.vmem_to_hbm [thread:$0]  (%p773_p2), %s317_s27, 64, %s319_s28, %s304_s19  }
 0x161 PF: > { %p477_p9 = scmp.ge.s32.totalorder %s679_s15, 2  ;;  %s330_s10 = sand.u32 1, %s667_s12  }
 0x162   : > { %s331_s21 = scalar_lea.sflag [#allocation4], %s330_s10 }
 0x163   : > { %p469_p10 = pnand %p477_p9, %p777_p4 }
 0x165   : > { %p470_p12 = pneg %p469_p10 }
 0x167   : > { %662 = dma.done.wait (%p470_p12), %s331_s21, 64  }
 0x168   : > { %664 = vsyncadd (%p470_p12), %s331_s21, 4294967232  ;;  %p17_p13 = scmp.ge.s32.totalorder %s747_s4, 6   ;;  %s862_s12 = smov %s671_s13 }
 0x169   : > { %s863_s13 = smov %s675_s14  ;;  %s864_s14 = smov %s758_s7 }
 0x16a   : > { %s865_s15 = smov %s747_s4  ;;  %19 = sbr.rel (!%p17_p13) target bundleno = 6 (0x6), region = 85 }
 0x16f   :  { %337 = vsyncpa [#allocation3], 1 }
 0x170   :  { %339 = vsyncpa [#allocation3 + $0x1], 1 }
 0x171   :  { %340 = vsyncpa [#allocation6], 1 }
 0x172   :  { %341 = vsyncpa [#allocation4], 1 }
 0x173   :  { %343 = vsyncpa [#allocation4 + $0x1], 1 }

</bundles_post_ra>
